<compile_context>
chip_gen: v7x
topology: tpu7x:2x2x1
jax: 0.10.0
libtpu: 0.0.40
codegen_flags: <defaults>
</compile_context>

<pallas_src>
import functools
import math

import jax
import jax.numpy as jnp
from jax.experimental import pallas as pl
from jax.experimental.pallas import tpu as pltpu


_VMEM_LIMIT = 48 * 1024 * 1024   # explicit scoped-VMEM budget, v7x-safe


# ---------------------------------------------------------------------------
# Tiling helper
# ---------------------------------------------------------------------------

def _pick_tile(dim, cap, align):
    """Largest divisor of `dim` that is <= cap and a multiple of `align`."""
    if dim <= cap:
        return dim
    start = cap - (cap % align)
    for t in range(start, 0, -align):
        if dim % t == 0:
            return t
    # TODO(synk): pad/mask a tail block for pathological dims (prime M etc.);
    # full-extent fallback is only hit for shapes with no aligned divisor.
    return dim


# ---------------------------------------------------------------------------
# Kernels
# ---------------------------------------------------------------------------

def _linear_kernel(x_ref, w_ref, b_ref, *rest, activation, has_residual,
                   has_ln, ln_eps):
    # ref order: x, w, b, [ln_gamma, ln_beta], [residual], out, acc(scratch)
    rest = list(rest)
    if has_ln:
        g_ref, be_ref = rest[0], rest[1]
        rest = rest[2:]
    if has_residual:
        r_ref = rest[0]
        rest = rest[1:]
    o_ref, acc_ref = rest

    k = pl.program_id(2)

    @pl.when(k == 0)
    def _():
        acc_ref[...] = jnp.zeros_like(acc_ref)

    x = x_ref[...]
    if has_ln:
        # Fused LayerNorm prologue (requires tk == full feature dim).
        xf = x.astype(jnp.float32)
        mu = jnp.mean(xf, axis=-1, keepdims=True)
        xc = xf - mu
        var = jnp.mean(xc * xc, axis=-1, keepdims=True)
        inv = jax.lax.rsqrt(var + ln_eps)
        x = (xc * inv * g_ref[...] + be_ref[...]).astype(w_ref.dtype)

    acc_ref[...] += jnp.dot(x, w_ref[...], preferred_element_type=jnp.float32)

    @pl.when(k == pl.num_programs(2) - 1)
    def _():
        y = acc_ref[...] + b_ref[...].astype(jnp.float32)
        if activation == "relu":
            y = jnp.maximum(y, 0.0)
        if has_residual:
            y = y + r_ref[...].astype(jnp.float32)
        o_ref[...] = y.astype(o_ref.dtype)


def _layernorm_kernel(x_ref, g_ref, b_ref, o_ref, *, eps):
    x = x_ref[...].astype(jnp.float32)                       # (tm, D)
    mu = jnp.mean(x, axis=-1, keepdims=True)
    xc = x - mu
    var = jnp.mean(xc * xc, axis=-1, keepdims=True)
    inv = jax.lax.rsqrt(var + eps)
    y = xc * inv * g_ref[...] + b_ref[...]
    o_ref[...] = y.astype(o_ref.dtype)


def _attn_kernel(qkv_ref, m_ref, o_ref, *, n_heads, dk, tq, scale,
                 approx_recip):
    # qkv_ref: (1, S, 3d) packed [Q | K | V] per row;  m_ref: (1, 1, S);
    # o_ref:   (1, tq, d)  lane-dense output block for this query tile.
    d = n_heads * dk
    qi = pl.program_id(1)
    row0 = pl.multiple_of(qi * tq, tq)
    mask_row = m_ref[0]                                      # (1, S), 1.0 = masked

    outs = []
    for hh in range(n_heads):                                # static per-head slices
        q_h = qkv_ref[0, pl.ds(row0, tq), hh * dk:(hh + 1) * dk]        # (tq, dk)
        k_h = qkv_ref[0, :, d + hh * dk:d + (hh + 1) * dk]              # (S,  dk)
        v_h = qkv_ref[0, :, 2 * d + hh * dk:2 * d + (hh + 1) * dk]      # (S,  dk)

        s = jax.lax.dot_general(q_h, k_h, (((1,), (1,)), ((), ())),
                                preferred_element_type=jnp.float32) * scale
        # masked_fill_(-inf): fully-masked query rows produce NaN exactly like
        # PyTorch softmax(all -inf) would.
        s = jnp.where(mask_row > 0.5, -jnp.inf, s)
        mx = jnp.max(s, axis=-1, keepdims=True)
        e = jnp.exp(s - mx)
        denom = jnp.sum(e, axis=-1, keepdims=True)
        p = e * pl.reciprocal(denom, approx=approx_recip)
        out_h = jnp.dot(p.astype(v_h.dtype), v_h,
                        preferred_element_type=jnp.float32)             # (tq, dk)
        outs.append(out_h)

    o_ref[0] = jnp.concatenate(outs, axis=-1).astype(o_ref.dtype)


# ---------------------------------------------------------------------------
# Pallas wrappers
# ---------------------------------------------------------------------------

def linear_pallas(x, w, b, *, activation=None, residual=None, ln=None,
                  ln_eps=1e-6, out_dtype=None):
    """y = [LN](x) @ w + b [, relu] [, + residual]  -- tiled MXU kernel."""
    m, kdim = x.shape
    _, n = w.shape
    out_dtype = out_dtype or x.dtype

    tm = _pick_tile(m, 512, 8)
    tn = _pick_tile(n, 512, 128)
    if ln is not None:
        tk = kdim            # LN prologue needs the full feature dim per block
    else:
        tk = _pick_tile(kdim, 512, 128)

    b2 = b.reshape(1, n)
    in_specs = [
        pl.BlockSpec((tm, tk), lambda i, j, k: (i, k)),
        pl.BlockSpec((tk, tn), lambda i, j, k: (k, j)),
        pl.BlockSpec((1, tn), lambda i, j, k: (0, j)),
    ]
    args = [x, w, b2]
    if ln is not None:
        g, be = ln
        in_specs += [pl.BlockSpec((1, tk), lambda i, j, k: (0, k)),
                     pl.BlockSpec((1, tk), lambda i, j, k: (0, k))]
        args += [g.reshape(1, kdim).astype(jnp.float32),
                 be.reshape(1, kdim).astype(jnp.float32)]
    if residual is not None:
        # TODO(synk): the residual tile is resident across all K steps; at
        # very large tiles move it to a separate lane-dense epilogue pass.
        in_specs.append(pl.BlockSpec((tm, tn), lambda i, j, k: (i, j)))
        args.append(residual)

    kernel = functools.partial(_linear_kernel,
                               activation=activation,
                               has_residual=residual is not None,
                               has_ln=ln is not None,
                               ln_eps=ln_eps)
    return pl.pallas_call(
        kernel,
        out_shape=jax.ShapeDtypeStruct((m, n), out_dtype),
        grid_spec=pltpu.PrefetchScalarGridSpec(
            num_scalar_prefetch=0,
            grid=(m // tm, n // tn, kdim // tk),
            in_specs=in_specs,
            out_specs=pl.BlockSpec((tm, tn), lambda i, j, k: (i, j)),
            scratch_shapes=[pltpu.VMEM((tm, tn), jnp.float32)],
        ),
        compiler_params=pltpu.CompilerParams(
            dimension_semantics=("parallel", "parallel", "arbitrary"),
            vmem_limit_bytes=_VMEM_LIMIT),
    )(*args)


def layernorm_pallas(x, gamma, beta, eps=1e-6, out_dtype=jnp.float32):
    """Standalone LayerNorm (only used for the final norm)."""
    m, d = x.shape
    tm = _pick_tile(m, 1024, 8)
    g2 = gamma.reshape(1, d).astype(jnp.float32)
    b2 = beta.reshape(1, d).astype(jnp.float32)
    return pl.pallas_call(
        functools.partial(_layernorm_kernel, eps=eps),
        out_shape=jax.ShapeDtypeStruct((m, d), out_dtype),
        grid=(m // tm,),
        in_specs=[
            pl.BlockSpec((tm, d), lambda i: (i, 0)),
            pl.BlockSpec((1, d), lambda i: (0, 0)),
            pl.BlockSpec((1, d), lambda i: (0, 0)),
        ],
        out_specs=pl.BlockSpec((tm, d), lambda i: (i, 0)),
        compiler_params=pltpu.CompilerParams(
            dimension_semantics=("parallel",),
            vmem_limit_bytes=_VMEM_LIMIT),
    )(x, g2, b2)


def mha_attention_pallas(qkv, mask_f, *, n_heads, scale, approx_recip=True,
                         out_dtype=None):
    """qkv: (B, S, 3d) packed projections; mask_f: (B, 1, S) float (1.0=masked).
    Returns the concatenated-head attention output (B, S, d)."""
    b, s, three_d = qkv.shape
    d = three_d // 3
    dk = d // n_heads
    tq = _pick_tile(s, 256, 8)
    out_dtype = out_dtype or qkv.dtype
    # TODO(synk): for very long S, K-tile the softmax (flash) and stream K/V
    # instead of holding the full (1, S, 3d) block.
    kernel = functools.partial(_attn_kernel, n_heads=n_heads, dk=dk, tq=tq,
                               scale=scale, approx_recip=approx_recip)
    return pl.pallas_call(
        kernel,
        out_shape=jax.ShapeDtypeStruct((b, s, d), out_dtype),
        grid=(b, s // tq),
        in_specs=[
            pl.BlockSpec((1, s, three_d), lambda bb, qi: (bb, 0, 0)),
            pl.BlockSpec((1, 1, s), lambda bb, qi: (bb, 0, 0)),
        ],
        out_specs=pl.BlockSpec((1, tq, d), lambda bb, qi: (bb, qi, 0)),
        compiler_params=pltpu.CompilerParams(
            dimension_semantics=("parallel", "arbitrary"),
            vmem_limit_bytes=_VMEM_LIMIT),
    )(qkv, mask_f)


# ---------------------------------------------------------------------------
# Module (parameter setup = plain JAX glue)
# ---------------------------------------------------------------------------

def _xavier_uniform(key, shape, dtype=jnp.float32):
    fan_in, fan_out = shape
    bound = math.sqrt(6.0 / (fan_in + fan_out))
    return jax.random.uniform(key, shape, dtype, minval=-bound, maxval=bound)


class EncoderPallas:
    """Pallas TPU implementation of Encoder.forward (pre-LN transformer)."""

    def __init__(self, num_layers, d_model, h, dropout, key,
                 dtype=jnp.bfloat16):
        assert d_model % h == 0
        self.num_layers = num_layers
        self.d_model = d_model
        self.h = h
        self.d_k = d_model // h
        self.dtype = dtype
        self.approx_recip = dtype != jnp.float32
        # TODO(synk): dropout treated as identity (eval/inference mode).
        del dropout

        layer_keys = jax.random.split(key, num_layers)
        self.layers = []
        for lk in layer_keys:
            ks = jax.random.split(lk, 6)
            wq = _xavier_uniform(ks[0], (d_model, d_model))
            wk = _xavier_uniform(ks[1], (d_model, d_model))
            wv = _xavier_uniform(ks[2], (d_model, d_model))
            zeros_d = jnp.zeros((d_model,), jnp.float32)
            self.layers.append(dict(
                # fused QKV projection: one (d, 3d) matmul
                w_qkv=jnp.concatenate([wq, wk, wv], axis=1).astype(dtype),
                b_qkv=jnp.zeros((3 * d_model,), dtype),
                wo=_xavier_uniform(ks[3], (d_model, d_model)).astype(dtype),
                bo=zeros_d.astype(dtype),
                w1=_xavier_uniform(ks[4], (d_model, 4 * d_model)).astype(dtype),
                b1=jnp.zeros((4 * d_model,), dtype),
                w2=_xavier_uniform(ks[5], (4 * d_model, d_model)).astype(dtype),
                b2=zeros_d.astype(dtype),
                # LN params stay f32 (tiny; LN math is f32 inside the kernels)
                ln0_g=jnp.ones((d_model,), jnp.float32), ln0_b=zeros_d,
                ln1_g=jnp.ones((d_model,), jnp.float32), ln1_b=zeros_d,
            ))
        self.lnf_g = jnp.ones((d_model,), jnp.float32)
        self.lnf_b = jnp.zeros((d_model,), jnp.float32)

    def __call__(self, x, mask):
        # x: (B, S, d_model); mask: key-padding mask broadcastable over heads
        # and query positions, e.g. (B, 1, 1, S) or (B, S), True = masked.
        b, s, d = x.shape
        assert s == mask.shape[-1]
        key_mask = mask.reshape(b, s)
        mask_f = key_mask.astype(jnp.float32).reshape(b, 1, s)

        scale = 1.0 / math.sqrt(self.d_k)
        xf = x.reshape(b * s, d).astype(self.dtype)

        for p in self.layers:
            # --- sublayer 0: self-attention (LN fused into the QKV matmul) ---
            qkv = linear_pallas(xf, p["w_qkv"], p["b_qkv"],
                                ln=(p["ln0_g"], p["ln0_b"]))
            attn = mha_attention_pallas(qkv.reshape(b, s, 3 * d), mask_f,
                                        n_heads=self.h, scale=scale,
                                        approx_recip=self.approx_recip)
            xf = linear_pallas(attn.reshape(b * s, d), p["wo"], p["bo"],
                               residual=xf)

            # --- sublayer 1: position-wise FFN (LN fused into W1 matmul) ---
            t = linear_pallas(xf, p["w1"], p["b1"],
                              ln=(p["ln1_g"], p["ln1_b"]), activation="relu")
            xf = linear_pallas(t, p["w2"], p["b2"], residual=xf)

        y = layernorm_pallas(xf, self.lnf_g, self.lnf_b)  # f32 output
        return y.reshape(b, s, d)


# ---------------------------------------------------------------------------
# Pure-JAX reference (for the self-test)
# ---------------------------------------------------------------------------

def _reference_encoder(enc, x, key_mask, eps=1e-6):
    hp = jax.lax.Precision.HIGHEST
    bsz, s, d = x.shape
    h, dk = enc.h, enc.d_k
    f32 = lambda a: jnp.asarray(a, jnp.float32)

    def ln(z, g, bb):
        mu = jnp.mean(z, -1, keepdims=True)
        var = jnp.mean((z - mu) ** 2, -1, keepdims=True)
        return (z - mu) / jnp.sqrt(var + eps) * g + bb

    def mm(a, b_):
        return jnp.matmul(a, b_, precision=hp)

    y = f32(x)
    for p in enc.layers:
        w_qkv, b_qkv = f32(p["w_qkv"]), f32(p["b_qkv"])
        wq, wk, wv = w_qkv[:, :d], w_qkv[:, d:2 * d], w_qkv[:, 2 * d:]
        bq, bk, bv = b_qkv[:d], b_qkv[d:2 * d], b_qkv[2 * d:]

        z = ln(y, f32(p["ln0_g"]), f32(p["ln0_b"]))
        q = mm(z, wq) + bq
        k = mm(z, wk) + bk
        v = mm(z, wv) + bv
        q = q.reshape(bsz, s, h, dk).transpose(0, 2, 1, 3)
        k = k.reshape(bsz, s, h, dk).transpose(0, 2, 1, 3)
        v = v.reshape(bsz, s, h, dk).transpose(0, 2, 1, 3)
        sc = mm(q, jnp.swapaxes(k, -1, -2)) / math.sqrt(dk)
        sc = jnp.where(key_mask[:, None, None, :], -jnp.inf, sc)
        a = jax.nn.softmax(sc, -1)
        o = mm(a, v).transpose(0, 2, 1, 3).reshape(bsz, s, d)
        y = y + (mm(o, f32(p["wo"])) + f32(p["bo"]))

        z = ln(y, f32(p["ln1_g"]), f32(p["ln1_b"]))
        t = jnp.maximum(mm(z, f32(p["w1"])) + f32(p["b1"]), 0.0)
        y = y + (mm(t, f32(p["w2"])) + f32(p["b2"]))
    return ln(y, f32(enc.lnf_g), f32(enc.lnf_b))


# ---------------------------------------------------------------------------
# Demo / self-test
# ---------------------------------------------------------------------------

if __name__ == "__main__":
    NUM_LAYERS, D_MODEL, H, DROPOUT = 2, 32, 4, 0.0
    B, S = 2, 8

    root = jax.random.PRNGKey(0)
    k_params, k_x = jax.random.split(root)

    x = jax.random.normal(k_x, (B, S, D_MODEL), dtype=jnp.float32)
    # key padding mask: last 2 positions of batch 1 are padded (True = masked)
    key_pad = jnp.zeros((B, S), dtype=bool).at[1, -2:].set(True)
    mask = key_pad[:, None, None, :]          # (B, 1, 1, S), PyTorch-style

    # --- f32 mode: tight numerical check of the kernel logic ---
    enc32 = EncoderPallas(NUM_LAYERS, D_MODEL, H, DROPOUT, k_params,
                          dtype=jnp.float32)
    y32 = jax.block_until_ready(enc32(x, mask))
    assert y32.shape == (B, S, D_MODEL)
    assert not bool(jnp.any(jnp.isnan(y32)))
    ref32 = _reference_encoder(enc32, x, key_pad)
    err32 = float(jnp.max(jnp.abs(y32 - ref32)))
    assert jnp.allclose(y32, ref32, atol=5e-3, rtol=5e-3), f"f32 err {err32}"

    # --- bf16 mode (default performance config): looser tolerance ---
    enc16 = EncoderPallas(NUM_LAYERS, D_MODEL, H, DROPOUT, k_params)
    y16 = jax.block_until_ready(enc16(x, mask))
    assert y16.shape == (B, S, D_MODEL)
    assert not bool(jnp.any(jnp.isnan(y16)))
    ref16 = _reference_encoder(enc16, x, key_pad)
    err16 = float(jnp.max(jnp.abs(y16.astype(jnp.float32) - ref16)))
    assert err16 < 1.5e-1, f"bf16 max abs err {err16}"

    print("KERNEL_OK")
</pallas_src>

<mosaic_0001>
module attributes {stable_mosaic.version = 11 : i64} {
  func.func @_linear_kernel(%arg0: i32, %arg1: i32, %arg2: i32, %arg3: memref<16x32xf32, #tpu.memory_space<vmem>>, %arg4: memref<32x96xf32, #tpu.memory_space<vmem>>, %arg5: memref<1x96xf32, #tpu.memory_space<vmem>>, %arg6: memref<1x32xf32, #tpu.memory_space<vmem>>, %arg7: memref<1x32xf32, #tpu.memory_space<vmem>>, %arg8: memref<16x96xf32, #tpu.memory_space<vmem>>, %arg9: memref<16x96xf32, #tpu.memory_space<vmem>>) attributes {dimension_semantics = [#tpu.dimension_semantics<parallel>, #tpu.dimension_semantics<parallel>, #tpu.dimension_semantics<arbitrary>], iteration_bounds = array<i64: 1, 1, 1>, scalar_prefetch = 0 : i64, scratch_operands = 1 : i64, tpu.core_type = #tpu.core_type<tc>, window_params = [{transform_indices = @transform_0, window_bounds = array<i64: 16, 32>}, {transform_indices = @transform_1, window_bounds = array<i64: 32, 96>}, {transform_indices = @transform_2, window_bounds = array<i64: 1, 96>}, {transform_indices = @transform_3, window_bounds = array<i64: 1, 32>}, {transform_indices = @transform_4, window_bounds = array<i64: 1, 32>}, {transform_indices = @transform_5, window_bounds = array<i64: 16, 96>}]} {
    %c0_i32 = arith.constant 0 : i32
    %0 = arith.cmpi eq, %arg2, %c0_i32 : i32
    %1 = arith.extui %0 : i1 to i32
    %c0_i32_0 = arith.constant 0 : i32
    %2 = arith.cmpi ne, %1, %c0_i32_0 : i32
    scf.if %2 {
      %cst_19 = arith.constant 0.000000e+00 : f32
      %34 = vector.broadcast %cst_19 : f32 to vector<16x96xf32>
      %c0_20 = arith.constant 0 : index
      %c0_21 = arith.constant 0 : index
      %35 = vector.load %arg9[%c0_20, %c0_21] : memref<16x96xf32, #tpu.memory_space<vmem>>, vector<16x96xf32>
      tpu.vector_store %arg9[%c0_20, %c0_21], %34 {strides = array<i32>} : memref<16x96xf32, #tpu.memory_space<vmem>>, vector<16x96xf32>,
    } else {
    }
    %c0 = arith.constant 0 : index
    %c0_1 = arith.constant 0 : index
    %3 = vector.load %arg3[%c0, %c0_1] : memref<16x32xf32, #tpu.memory_space<vmem>>, vector<16x32xf32>
    %cst = arith.constant dense<0.000000e+00> : vector<16xf32>
    %4 = vector.multi_reduction <add>, %3, %cst [1] : vector<16x32xf32> to vector<16xf32>
    %5 = vector.shape_cast %4 : vector<16xf32> to vector<16x1xf32>
    %cst_2 = arith.constant 3.200000e+01 : f32
    %6 = vector.broadcast %cst_2 : f32 to vector<16x1xf32>
    %7 = arith.divf %5, %6 : vector<16x1xf32>
    %8 = vector.broadcast %7 : vector<16x1xf32> to vector<16x32xf32>
    %9 = arith.subf %3, %8 : vector<16x32xf32>
    %10 = arith.mulf %9, %9 : vector<16x32xf32>
    %cst_3 = arith.constant dense<0.000000e+00> : vector<16xf32>
    %11 = vector.multi_reduction <add>, %10, %cst_3 [1] : vector<16x32xf32> to vector<16xf32>
    %12 = vector.shape_cast %11 : vector<16xf32> to vector<16x1xf32>
    %cst_4 = arith.constant 3.200000e+01 : f32
    %13 = vector.broadcast %cst_4 : f32 to vector<16x1xf32>
    %14 = arith.divf %12, %13 : vector<16x1xf32>
    %cst_5 = arith.constant 9.99999997E-7 : f32
    %15 = vector.broadcast %cst_5 : f32 to vector<16x1xf32>
    %16 = arith.addf %14, %15 : vector<16x1xf32>
    %17 = math.rsqrt %16 : vector<16x1xf32>
    %18 = vector.broadcast %17 : vector<16x1xf32> to vector<16x32xf32>
    %19 = arith.mulf %9, %18 : vector<16x32xf32>
    %c0_6 = arith.constant 0 : index
    %c0_7 = arith.constant 0 : index
    %20 = vector.load %arg6[%c0_6, %c0_7] : memref<1x32xf32, #tpu.memory_space<vmem>>, vector<1x32xf32>
    %21 = vector.broadcast %20 : vector<1x32xf32> to vector<16x32xf32>
    %22 = arith.mulf %19, %21 : vector<16x32xf32>
    %c0_8 = arith.constant 0 : index
    %c0_9 = arith.constant 0 : index
    %23 = vector.load %arg7[%c0_8, %c0_9] : memref<1x32xf32, #tpu.memory_space<vmem>>, vector<1x32xf32>
    %24 = vector.broadcast %23 : vector<1x32xf32> to vector<16x32xf32>
    %25 = arith.addf %22, %24 : vector<16x32xf32>
    %c0_10 = arith.constant 0 : index
    %c0_11 = arith.constant 0 : index
    %26 = vector.load %arg9[%c0_10, %c0_11] : memref<16x96xf32, #tpu.memory_space<vmem>>, vector<16x96xf32>
    %c0_12 = arith.constant 0 : index
    %c0_13 = arith.constant 0 : index
    %27 = vector.load %arg4[%c0_12, %c0_13] : memref<32x96xf32, #tpu.memory_space<vmem>>, vector<32x96xf32>
    %cst_14 = arith.constant dense<0.000000e+00> : vector<16x96xf32>
    %28 = tpu.matmul %25, %27, %cst_14 {dimension_numbers = #tpu.dot_dimension_numbers<[1], [0], [0], [1], [0, 0, 1, 1], [], []>} : vector<16x32xf32>, vector<32x96xf32>, vector<16x96xf32> -> vector<16x96xf32>
    %29 = arith.addf %26, %28 : vector<16x96xf32>
    %c0_15 = arith.constant 0 : index
    %c0_16 = arith.constant 0 : index
    %30 = vector.load %arg9[%c0_15, %c0_16] : memref<16x96xf32, #tpu.memory_space<vmem>>, vector<16x96xf32>
    tpu.vector_store %arg9[%c0_15, %c0_16], %29 {strides = array<i32>} : memref<16x96xf32, #tpu.memory_space<vmem>>, vector<16x96xf32>,
    %c0_i32_17 = arith.constant 0 : i32
    %31 = arith.cmpi eq, %arg2, %c0_i32_17 : i32
    %32 = arith.extui %31 : i1 to i32
    %c0_i32_18 = arith.constant 0 : i32
    %33 = arith.cmpi ne, %32, %c0_i32_18 : i32
    scf.if %33 {
      %c0_19 = arith.constant 0 : index
      %c0_20 = arith.constant 0 : index
      %34 = vector.load %arg9[%c0_19, %c0_20] : memref<16x96xf32, #tpu.memory_space<vmem>>, vector<16x96xf32>
      %c0_21 = arith.constant 0 : index
      %c0_22 = arith.constant 0 : index
      %35 = vector.load %arg5[%c0_21, %c0_22] : memref<1x96xf32, #tpu.memory_space<vmem>>, vector<1x96xf32>
      %36 = vector.broadcast %35 : vector<1x96xf32> to vector<16x96xf32>
      %37 = arith.addf %34, %36 : vector<16x96xf32>
      %c0_23 = arith.constant 0 : index
      %c0_24 = arith.constant 0 : index
      %38 = vector.load %arg8[%c0_23, %c0_24] : memref<16x96xf32, #tpu.memory_space<vmem>>, vector<16x96xf32>
      tpu.vector_store %arg8[%c0_23, %c0_24], %37 {strides = array<i32>} : memref<16x96xf32, #tpu.memory_space<vmem>>, vector<16x96xf32>,
    } else {
    }
    return
  }
  func.func @transform_0(%arg0: i32, %arg1: i32, %arg2: i32) -> (i32, i32) {
    %c0_i32 = arith.constant 0 : i32
    return %arg0, %arg2 : i32, i32
  }
  func.func @transform_1(%arg0: i32, %arg1: i32, %arg2: i32) -> (i32, i32) {
    %c0_i32 = arith.constant 0 : i32
    return %arg2, %arg1 : i32, i32
  }
  func.func @transform_2(%arg0: i32, %arg1: i32, %arg2: i32) -> (i32, i32) {
    %c0_i32 = arith.constant 0 : i32
    %c0_i32_0 = arith.constant 0 : i32
    return %c0_i32, %arg1 : i32, i32
  }
  func.func @transform_3(%arg0: i32, %arg1: i32, %arg2: i32) -> (i32, i32) {
    %c0_i32 = arith.constant 0 : i32
    %c0_i32_0 = arith.constant 0 : i32
    return %c0_i32, %arg2 : i32, i32
  }
  func.func @transform_4(%arg0: i32, %arg1: i32, %arg2: i32) -> (i32, i32) {
    %c0_i32 = arith.constant 0 : i32
    %c0_i32_0 = arith.constant 0 : i32
    return %c0_i32, %arg2 : i32, i32
  }
  func.func @transform_5(%arg0: i32, %arg1: i32, %arg2: i32) -> (i32, i32) {
    %c0_i32 = arith.constant 0 : i32
    return %arg0, %arg1 : i32, i32
  }
}

</mosaic_0001>

<bundles_post_ra>
// kernel: tpu_custom_call.1
= control target key start
LH: loop header
LB: loop body
LE: loop exit
PB: predicated region body
PF: predicated region fallthrough
CT: control target
= control target key end

     0   :  { %10 = vsyncpa [#allocation4], 0  ;;  %s444_s0 = inlined_call_operand.hbm [shape: f32[16,32], index: 0, kind: input, shape index: {}]   ;;  %s445_s1 = inlined_call_operand.hbm [shape: f32[32,96], index: 1, kind: input, shape index: {}]   ;;  %s446_s2 = inlined_call_operand.vmem [shape: f32[1,96], index: 2, kind: input, shape index: {}]   ;;  %s447_s3 = inlined_call_operand.vmem [shape: f32[1,32], index: 3, kind: input, shape index: {}]   ;;  %s448_s4 = inlined_call_operand.vmem [shape: f32[1,32], index: 4, kind: input, shape index: {}]   ;;  %s449_s5 = inlined_call_operand.hbm [shape: f32[16,96], index: 5, kind: output, shape index: {}]  }
   0x1   :  { %11 = vsyncpa [#allocation7], 0 }
   0x2   :  { %12 = vsyncpa [#allocation5], 0  ;;  %s342_s18 = smov [#allocation3]   ;;  %s270_s22 = scalar_lea.hbm %s444_s0, 256 }
   0x3   :  { %s18_s19 = sshll.u32 %s342_s18, 4  ;;  %p271_p0 = scmp.ne.s32.totalorder %s444_s0, %s270_s22  ;;  %s19_s19 = int_to_ptr.vmem [resolvable:$true] %s18_s19 }
   0x4   :  { %p274_p1 = scmp.lt.u32.totalorder %s270_s22, %s444_s0 }
   0x6   :  { %p276_p2 = pnand %p274_p1, %p271_p0 }
   0x8   :  { %279 = shalt.err (!%p276_p2)
}
   0x9   :  { %s280_s27 = scalar_lea.vmem %s19_s19, 256  ;;  %p285_p4 = scmp.lt.s32.totalorder %s19_s19, %s19_s19 }
   0xa   :  { %p281_p3 = scmp.ne.s32.totalorder %s19_s19, %s280_s27  ;;  %p286_p5 = scmp.lt.s32.totalorder %s280_s27, %s280_s27 }
   0xc   :  { %p287_p6 = por %p286_p5, %p285_p4 }
   0xe   :  { %p288_p7 = pnand %p287_p6, %p281_p3 }
  0x10   :  { %291 = shalt.err (!%p288_p7)
}
  0x11   :  { %s343_s28 = smov 128   ;;  %s344_s29 = smov 8  }
  0x12   :  { %24 = dma.hbm_to_vmem [thread:$0]  %s444_s0, 256, %s19_s19, [#allocation4], %s343_s28, %s343_s28, %s344_s29  }
  0x13   :  { %s345_s7 = smov [#allocation6]   ;;  %s292_s11 = scalar_lea.hbm %s445_s1, 512 }
  0x14   :  { %s30_s8 = sshll.u32 %s345_s7, 4  ;;  %p293_p8 = scmp.ne.s32.totalorder %s445_s1, %s292_s11  ;;  %s31_s8 = int_to_ptr.vmem [resolvable:$true] %s30_s8 }
  0x15   :  { %p296_p9 = scmp.lt.u32.totalorder %s292_s11, %s445_s1 }
  0x17   :  { %p298_p10 = pnand %p296_p9, %p293_p8 }
  0x19   :  { %301 = shalt.err (!%p298_p10)
}
  0x1a   :  { %s302_s16 = scalar_lea.vmem %s31_s8, 512  ;;  %p307_p12 = scmp.lt.s32.totalorder %s31_s8, %s31_s8 }
  0x1b   :  { %p303_p11 = scmp.ne.s32.totalorder %s31_s8, %s302_s16  ;;  %p308_p13 = scmp.lt.s32.totalorder %s302_s16, %s302_s16 }
  0x1d   :  { %p309_p0 = por %p308_p13, %p307_p12 }
  0x1f   :  { %p310_p1 = pnand %p309_p0, %p303_p11 }
  0x21   :  { %313 = shalt.err (!%p310_p1)
}
  0x22   :  { %36 = dma.hbm_to_vmem [thread:$0]  %s445_s1, 512, %s31_s8, [#allocation7], %s343_s28, %s343_s28, %s344_s29  }
  0x23   :  { %336 = dma.done.wait [#allocation4], 256  }
  0x24   :  { %337 = vsyncadd [#allocation4], 4294967040 }
  0x25   :  { %338 = dma.done.wait [#allocation7], 512  }
  0x26   :  { %339 = vsyncadd [#allocation7], 4294966784  ;;  %vm58_vm0 = vcmask 261120   ;;  %v56_v0 = vld [vmem:[#allocation3] sm:$0xff]  ;;  %v57_v1 = vld [vmem:[#allocation3 + $0x8] sm:$0xff]  ;;  %vm53_vm1 = vcmask 785408  }
  0x27   :  { %v59_v2 = vsel %vm58_vm0, %v56_v0, 0.0  ;;  %v62_v3 = vsel %vm58_vm0, %v57_v1, 0.0  ;;  %v106_v14 = vld [vmem:[#allocation6] sm:$0xff]  ;;  %v107_v15 = vld [vmem:[#allocation6 + $0x8] sm:$0xff]  ;;  %v108_v16 = vld [vmem:[#allocation6 + $0x10] sm:$0xff]  ;;  %v346_v20 = vmov 0.0  }
  0x28   :  { %60 = vadd.xlane.f32.xlu0 %v59_v2  ;;  %v252_v17 = vpack.c.bf16 %v107_v15, %v106_v14  ;;  %v109_v18 = vld [vmem:[#allocation6 + $0x18] sm:$0xff]  ;;  %55 = vst.msk [vmem:[#allocation2 + $0x8] sm:$0xff] %vm53_vm1, %v346_v20  ;;  %54 = vst.msk [vmem:[#allocation2] sm:$0xff] %vm53_vm1, %v346_v20  ;;  %v230_v28 = vld [vmem:[%s447_s3] ss:$0 sm:$0xff]  ;;  %s347_s21 = smov [#allocation8]  }
  0x29   :  { %v256_v19 = vpack.c.bf16 %v109_v18, %v108_v16  ;;  %v231_v30 = vld [vmem:[%s448_s4] ss:$0 sm:$0xff]  ;;  %s217_s22 = sshll.u32 %s347_s21, 4  ;;  %s218_s22 = int_to_ptr.vmem [resolvable:$true] %s217_s22 }
  0x2a   :  { %253 = vmatprep.subr.bf16.mxu0 %v252_v17  ;;  %v234_v43 = vld [vmem:[%s446_s2] ss:$0 sm:$0xff]  ;;  %s314_s23 = scalar_lea.vmem %s218_s22, 256  ;;  %p319_p3 = scmp.lt.s32.totalorder %s218_s22, %s218_s22 }
  0x2b   :  { %255 = vmatpush3.bf16.msra.mxu0 %v252_v17  ;;  %p315_p2 = scmp.ne.s32.totalorder %s218_s22, %s314_s23  ;;  %p320_p4 = scmp.lt.s32.totalorder %s314_s23, %s314_s23 }
  0x2c   :  { %63 = vadd.xlane.f32.xlu0 %v62_v3  ;;  %257 = vmatprep.subr.bf16.mxu0 %v256_v19 }
  0x2d   :  { %p321_p5 = por %p320_p4, %p319_p3 }
  0x2f   :  { %259 = vmatpush3.bf16.msra.mxu0 %v256_v19  ;;  %v105_v37 = vld [vmem:[#allocation2 + $0x8] sm:$0xff]  ;;  %v104_v38 = vld [vmem:[#allocation2] sm:$0xff]  ;;  %p322_p6 = pnand %p321_p5, %p315_p2 }
  0xb5   :  { %v61_v4 = vpop.xlane.xlu0 %60 }
  0xb6   :  { %v66_v5 = vmul.f32 0.03125, %v61_v4 }
  0xb8   :  { %v68_v6 = vsub.f32 %v56_v0, %v66_v5 }
  0xb9   :  { %v64_v7 = vpop.xlane.xlu0 %63 }
  0xba   :  { %v67_v8 = vmul.f32 0.03125, %v64_v7  ;;  %v70_v9 = vmul.f32 %v68_v6, %v68_v6 }
  0xbc   :  { %v69_v10 = vsub.f32 %v57_v1, %v67_v8  ;;  %v72_v11 = vsel %vm58_vm0, %v70_v9, 0.0 }
  0xbd   :  { %73 = vadd.xlane.f32.xlu1 %v72_v11 }
  0xbe   :  { %v71_v12 = vmul.f32 %v69_v10, %v69_v10 }
  0xc0   :  { %v75_v13 = vsel %vm58_vm0, %v71_v12, 0.0 }
  0xc1   :  { %76 = vadd.xlane.f32.xlu1 %v75_v13 }
 0x14a   :  { %v74_v21 = vpop.xlane.xlu1 %73 }
 0x14b   :  { %v78_v22 = vmul.f32 0.03125, %v74_v21 }
 0x14d   :  { %v80_v23 = vadd.f32 1e-06, %v78_v22 }
 0x14e   :  { %v77_v24 = vpop.xlane.xlu1 %76 }
 0x14f   :  { %266 = vrsqrt.f32 %v80_v23  ;;  %v79_v25 = vmul.f32 0.03125, %v77_v24 }
 0x151   :  { %v81_v26 = vadd.f32 1e-06, %v79_v25 }
 0x153   :  { %268 = vrsqrt.f32 %v81_v26 }
 0x159   :  { %v267_v27 = vpop.eup %266 }
 0x15a   :  { %v84_v29 = vmul.f32 %v267_v27, %v68_v6 }
 0x15c   :  { %v93_v31 = vmul.f32 %v230_v28, %v84_v29 }
 0x15d   :  { %v269_v32 = vpop.eup %268 }
 0x15e   :  { %v85_v33 = vmul.f32 %v269_v32, %v69_v10  ;;  %v102_v34 = vadd.f32 %v231_v30, %v93_v31 }
 0x160   :  { %v94_v35 = vmul.f32 %v230_v28, %v85_v33  ;;  %249 = vmatprep.mubr.msk.f32.mxu0 %vm58_vm0, %v102_v34 }
 0x162   :  { %v103_v36 = vadd.f32 %v231_v30, %v94_v35 }
 0x164   :  { %250 = vmatmul.mubr.msk.f32.vlgmr.msra.gmra.mrb[0].mxu0 %vm58_vm0, %v103_v36 }
 0x237   :  { %v251_v39 = vpop.f32.mrb[0].mxu0 }
 0x238   :  { %v192_v40 = vadd.f32 %v251_v39, %v105_v37  ;;  %v182_v41 = vpop.f32.mrb[1].mxu0 }
 0x239   :  { %v191_v42 = vadd.f32 %v182_v41, %v104_v38 }
 0x23a   :  { %195 = vst.msk [vmem:[#allocation2 + $0x8] sm:$0xff] %vm53_vm1, %v192_v40 }
 0x23b   :  { %194 = vst.msk [vmem:[#allocation2] sm:$0xff] %vm53_vm1, %v191_v42 }
 0x241   :  { %v200_v44 = vld [vmem:[#allocation2 + $0x8] sm:$0xff] }
 0x242   :  { %v199_v45 = vld [vmem:[#allocation2] sm:$0xff]  ;;  %v209_v46 = vadd.f32 %v234_v43, %v200_v44 }
 0x243   :  { %v208_v47 = vadd.f32 %v234_v43, %v199_v45 }
 0x244   :  { %211 = vst.msk [vmem:[#allocation8 + $0x8] sm:$0xff] %vm53_vm1, %v209_v46 }
 0x245   :  { %210 = vst.msk [vmem:[#allocation8] sm:$0xff] %vm53_vm1, %v208_v47 }
 0x246   :  { %325 = shalt.err (!%p322_p6)
}
 0x247   :  { %s326_s25 = scalar_lea.hbm %s449_s5, 256 }
 0x248   :  { %p327_p7 = scmp.ne.s32.totalorder %s449_s5, %s326_s25  ;;  %p330_p8 = scmp.lt.u32.totalorder %s326_s25, %s449_s5 }
 0x24a   :  { %p332_p9 = pnand %p330_p8, %p327_p7 }
 0x24c   :  { %335 = shalt.err (!%p332_p9)
}
 0x24d   :  { %223 = dma.vmem_to_hbm [thread:$0]  %s218_s22, 256, %s449_s5, [#allocation5], %s343_s28, %s343_s28, %s344_s29  }
 0x24e   :  { %340 = dma.done.wait [#allocation5], 256  }
 0x24f   :  { %341 = vsyncadd [#allocation5], 4294967040 }
 0x250   :  { %227 = vsyncpa [#allocation4], 1 }
 0x251   :  { %228 = vsyncpa [#allocation7], 1 }
 0x252   :  { %229 = vsyncpa [#allocation5], 1 }

</bundles_post_ra>
